<compile_context>
chip_gen: v7x
topology: tpu7x:2x2x1
jax: 0.10.0
libtpu: 0.0.40
codegen_flags: <defaults>
</compile_context>

<pallas_src>
import functools
import math

import jax
import jax.numpy as jnp
from jax.experimental import pallas as pl
from jax.experimental.pallas import tpu as pltpu


def _round_up(x, m):
    return ((x + m - 1) // m) * m


def _vmem_budget_bytes():
    """~80% of physical per-core VMEM, with a conservative fallback."""
    try:
        cap = int(pltpu.get_tpu_info().vmem_capacity_bytes)
    except Exception:
        cap = 64 * 1024 * 1024          # safe on every generation (v7x = 64 MiB)
    return min(int(cap * 0.8), 112 * 1024 * 1024)


def _default_mxu_bf16():
    """bf16 MXU operands / bf16 Wh scratch are a win on v6e/v7x, not on v5e."""
    try:
        kind = jax.devices()[0].device_kind.lower()
    except Exception:
        return False
    return ("v6" in kind) or ("v7" in kind)


def _plan_tiles(n_pad, din, dout, scratch_itemsize, budget, max_key_tile=None):
    """Pick (tq, tk) so scratch + pipeline buffers + live (tq,tk) temps fit VMEM."""
    lane = 128
    daug_pad = _round_up(dout + 1, lane)
    din_pad = _round_up(din, lane)
    dout_pad = _round_up(dout, lane)

    # Key tile: full width for small graphs, else the largest 128-multiple
    # divisor of n_pad that is <= 2048 (online softmax keeps temps O(tq*tk)).
    if n_pad <= 2048:
        tk = n_pad
    else:
        tk = 128
        for cand in (2048, 1024, 512, 256):
            if n_pad % cand == 0:
                tk = cand
                break
    if max_key_tile is not None:
        tk = max(lane, min(tk, (max_key_tile // lane) * lane))
        while n_pad % tk:
            tk -= lane

    # Fixed VMEM: consolidated Wh scratch (lane-padded) + double-buffered blocks.
    fixed = (n_pad * daug_pad * scratch_itemsize        # [Wh | Wh@a1] scratch
             + 2 * n_pad * din_pad * 4                  # h block (2 pipeline bufs)
             + 2 * 8 * n_pad * 4                        # (Wh@a2)^T row block
             + 2 * _round_up(din, 8) * daug_pad * 4)    # w_aug block

    tq = 16
    for cand in (512, 256, 128, 64, 32, 16):
        if n_pad % cand:
            continue
        live = 4 * (3 * cand * tk + 2 * cand * daug_pad + cand * din_pad)
        out_blk = 2 * 4 * cand * dout_pad
        if fixed + live + out_blk <= budget:
            tq = cand
            break
    return tq, tk


def _gat_kernel(h_ref, row_ref, waug_ref, o_ref, whaug_sc, *,
                alpha, dout, tq, tk, mxu_bf16):
    """One (graph b, query-row tile q) grid step.

    h_ref    : (1, N, Din)    zero-padded node features (same block for all q)
    row_ref  : (1, 1, N)      (Wh @ a2)^T, key padding filled with -1e30
    waug_ref : (Din, Dout+1)  [W | W @ a1]
    o_ref    : (1, tq, Dout)  output rows of this tile
    whaug_sc : (N, Dout+1)    [Wh | Wh@a1] scratch, carried across q tiles
    """
    q = pl.program_id(1)
    n_pad = whaug_sc.shape[0]
    daug = dout + 1
    nk = n_pad // tk

    # ---- per-graph prologue (q == 0): projection into consolidated scratch ----
    @pl.when(q == 0)
    def _():
        w = waug_ref[...]
        if mxu_bf16:
            w = w.astype(jnp.bfloat16)
        h2 = h_ref.at[0]                                  # (N, Din) ref view

        @pl.loop(0, n_pad // tq)
        def _(c):
            c0 = pl.multiple_of(c * tq, tq)
            hc = h2[pl.ds(c0, tq), :]
            if mxu_bf16:
                hc = hc.astype(jnp.bfloat16)
            whc = jnp.dot(hc, w, preferred_element_type=jnp.float32)
            whaug_sc[pl.ds(c0, tq), :] = whc.astype(whaug_sc.dtype)

    # ---- attention for this query-row tile ----
    row2 = row_ref.at[0]                                  # (1, N) ref view
    r0 = pl.multiple_of(q * tq, tq)
    wh1 = whaug_sc[pl.ds(r0, tq), :][:, dout:daug].astype(jnp.float32)   # (tq, 1)

    def _scores(row_chunk):                               # LeakyReLU(Wh1 + Wh2^T)
        e = wh1 + row_chunk
        return jnp.where(e > 0, e, alpha * e)

    if nk == 1:
        # Single-pass softmax: whole key axis fits one tile.
        e = _scores(row2[...])                            # (tq, N)
        m = jnp.max(e, axis=1, keepdims=True)
        p = jnp.exp(e - m)
        s = jnp.sum(p, axis=1, keepdims=True)
        if mxu_bf16:
            p = p.astype(jnp.bfloat16)
        acc = jnp.dot(p, whaug_sc[...], preferred_element_type=jnp.float32)
    else:
        # Flash-style online softmax over key tiles: temps stay O(tq*tk).
        def kv_step(kt, carry):
            m, s, acc = carry
            k0 = pl.multiple_of(kt * tk, tk)
            e = _scores(row2[:, pl.ds(k0, tk)])           # (tq, tk)
            m_new = jnp.maximum(m, jnp.max(e, axis=1, keepdims=True))
            corr = jnp.exp(m - m_new)
            p = jnp.exp(e - m_new)
            s_new = corr * s + jnp.sum(p, axis=1, keepdims=True)
            if mxu_bf16:
                p = p.astype(jnp.bfloat16)
            wh_k = whaug_sc[pl.ds(k0, tk), :]
            acc_new = corr * acc + jnp.dot(p, wh_k,
                                           preferred_element_type=jnp.float32)
            return m_new, s_new, acc_new

        init = (jnp.full((tq, 1), -jnp.inf, jnp.float32),
                jnp.zeros((tq, 1), jnp.float32),
                jnp.zeros((tq, daug), jnp.float32))
        _, s, acc = jax.lax.fori_loop(0, nk, kv_step, init)

    # Softmax normalisation: EUP approx reciprocal + one Newton step (~f32 exact).
    inv = pl.reciprocal(s, approx=True)
    inv = inv * (2.0 - s * inv)
    hp = acc[:, :dout] * inv

    # TODO(synk): F.dropout(attention, 0.6, training=True) is stochastic; this
    # kernel implements eval-mode semantics (dropout = identity).
    # ELU (alpha=1). exp(x)-1 kept (instead of expm1) to guarantee Mosaic lowering.
    o_ref[0] = jnp.where(hp > 0, hp, jnp.exp(hp) - 1.0).astype(o_ref.dtype)


def gat_layer_forward(h, adj, W, a, *, alpha=0.2, mxu_bf16=None, max_key_tile=None):
    """Pallas GATLayer forward.

    `adj` is accepted for signature fidelity but, exactly like the reference
    PyTorch forward, it is not used (no neighbourhood masking).
    `h` may be (N, Din) (single graph, like the PyTorch module) or (B, N, Din).
    `mxu_bf16=None` -> auto (True on v6e/v7x, False on v5e).
    `max_key_tile` optionally forces a smaller key tile (testing / tuning).
    """
    del adj
    if mxu_bf16 is None:
        mxu_bf16 = _default_mxu_bf16()

    squeeze = (h.ndim == 2)
    if squeeze:
        h = h[None]
    h = h.astype(jnp.float32)
    W = W.astype(jnp.float32)
    a = a.astype(jnp.float32)
    b, n, din = h.shape
    dout = W.shape[1]

    # Fold a1 into the projection: one MXU pass in-kernel yields [Wh | Wh@a1].
    w_aug = jnp.concatenate([W, W @ a[:dout]], axis=1)            # (Din, Dout+1)

    # (Wh @ a2)^T computed wrapper-side (hoists the (N,1)->(1,N) transpose out
    # of the kernel); padded key columns get -1e30 so their softmax weight is 0.
    row = jnp.swapaxes(h @ (W @ a[dout:]), 1, 2)                  # (B, 1, N)

    n_pad = _round_up(n, 128)
    if n_pad != n:
        h = jnp.pad(h, ((0, 0), (0, n_pad - n), (0, 0)))
        row = jnp.pad(row, ((0, 0), (0, 0), (0, n_pad - n)),
                      constant_values=-1e30)

    budget = _vmem_budget_bytes()
    scratch_dtype = jnp.bfloat16 if mxu_bf16 else jnp.float32
    tq, tk = _plan_tiles(n_pad, din, dout, jnp.dtype(scratch_dtype).itemsize,
                         budget, max_key_tile)
    grid = (b, n_pad // tq)

    kernel = functools.partial(_gat_kernel, alpha=alpha, dout=dout, tq=tq, tk=tk,
                               mxu_bf16=mxu_bf16)

    cost = pl.CostEstimate(
        flops=int(b * (2 * n_pad * din * (dout + 1)          # projection
                       + 2 * n_pad * n_pad * (dout + 1)      # attn @ [Wh|Wh@a1]
                       + 6 * n_pad * n_pad)),                # leakyrelu/softmax
        transcendentals=int(b * n_pad * n_pad),
        bytes_accessed=int(4 * (h.size + row.size + w_aug.size + b * n_pad * dout)))

    out = pl.pallas_call(
        kernel,
        out_shape=jax.ShapeDtypeStruct((b, n_pad, dout), jnp.float32),
        grid_spec=pltpu.PrefetchScalarGridSpec(
            num_scalar_prefetch=0,
            grid=grid,
            in_specs=[
                pl.BlockSpec((1, n_pad, din), lambda bi, qi: (bi, 0, 0)),
                pl.BlockSpec((1, 1, n_pad), lambda bi, qi: (bi, 0, 0)),
                pl.BlockSpec((din, dout + 1), lambda bi, qi: (0, 0)),
            ],
            out_specs=pl.BlockSpec((1, tq, dout), lambda bi, qi: (bi, qi, 0)),
            scratch_shapes=[
                pltpu.VMEM((n_pad, dout + 1), scratch_dtype),   # [Wh | Wh@a1]
            ],
        ),
        compiler_params=pltpu.CompilerParams(
            # batch axis shards across TensorCores (megacore); the q axis
            # carries the per-graph scratch (prologue at q == 0) -> "arbitrary".
            dimension_semantics=("parallel", "arbitrary"),
            vmem_limit_bytes=budget),
        cost_estimate=cost,
    )(h, row, w_aug)

    out = out[:, :n, :]
    return out[0] if squeeze else out


def _xavier_uniform(key, shape, gain):
    fan_in, fan_out = shape[0], shape[1]
    bound = gain * math.sqrt(6.0 / (fan_in + fan_out))
    return jax.random.uniform(key, shape, jnp.float32, -bound, bound)


def _reference_single(h, W, a, alpha=0.2):
    wh = h @ W
    dout = W.shape[1]
    e = wh @ a[:dout] + (wh @ a[dout:]).T
    e = jnp.where(e > 0, e, alpha * e)
    attn = jax.nn.softmax(e, axis=1)
    hp = attn @ wh
    return jnp.where(hp > 0, hp, jnp.exp(hp) - 1.0)


if __name__ == "__main__":
    key = jax.random.PRNGKey(0)
    k_h, k_adj, k_w, k_a, k_h2 = jax.random.split(key, 5)

    B, N, INPUT_DIM, OUTPUT_DIM = 4, 8, 16, 8
    ALPHA = 0.2

    # deterministic parameter init (xavier_uniform, gain=1.414)
    W = _xavier_uniform(k_w, (INPUT_DIM, OUTPUT_DIM), gain=1.414)
    a = _xavier_uniform(k_a, (2 * OUTPUT_DIM, 1), gain=1.414)

    # example inputs: small batch of graphs (adj unused, matching the reference)
    h = jax.random.normal(k_h, (B, N, INPUT_DIM), jnp.float32)
    adj = (jax.random.uniform(k_adj, (B, N, N)) > 0.5).astype(jnp.float32)

    ref = jax.vmap(lambda hb: _reference_single(hb, W, a, ALPHA))(h)

    # f32 path, batched
    out = jax.block_until_ready(
        gat_layer_forward(h, adj, W, a, alpha=ALPHA, mxu_bf16=False))
    assert out.shape == (B, N, OUTPUT_DIM)
    assert jnp.allclose(out, ref, atol=1e-4, rtol=1e-4), "batched mismatch"

    # single-graph path (same call signature as the PyTorch module forward)
    out1 = jax.block_until_ready(
        gat_layer_forward(h[0], adj[0], W, a, alpha=ALPHA, mxu_bf16=False))
    assert out1.shape == (N, OUTPUT_DIM)
    assert jnp.allclose(out1, ref[0], atol=1e-4, rtol=1e-4), "single-graph mismatch"

    # non-128-multiple N: exercises lane padding + the online-softmax key loop
    N2 = 300
    h2 = jax.random.normal(k_h2, (2, N2, INPUT_DIM), jnp.float32)
    adj2 = jnp.ones((2, N2, N2), jnp.float32)
    ref2 = jax.vmap(lambda hb: _reference_single(hb, W, a, ALPHA))(h2)
    out2 = jax.block_until_ready(
        gat_layer_forward(h2, adj2, W, a, alpha=ALPHA, mxu_bf16=False,
                          max_key_tile=128))
    assert out2.shape == (2, N2, OUTPUT_DIM)
    assert jnp.allclose(out2, ref2, atol=1e-4, rtol=1e-4), "padded/online mismatch"

    # bf16 MXU-operand + bf16 scratch path (v6e/v7x); f32 accumulation everywhere
    out_bf = jax.block_until_ready(
        gat_layer_forward(h, adj, W, a, alpha=ALPHA, mxu_bf16=True))
    assert jnp.allclose(out_bf, ref, atol=5e-2, rtol=5e-2), "bf16 mismatch"

    print("KERNEL_OK")
</pallas_src>

<mosaic_0001>
module attributes {stable_mosaic.version = 11 : i64} {
  func.func @_gat_kernel(%arg0: i32, %arg1: i32, %arg2: memref<1x128x16xf32, #tpu.memory_space<vmem>>, %arg3: memref<1x1x128xf32, #tpu.memory_space<vmem>>, %arg4: memref<16x9xf32, #tpu.memory_space<vmem>>, %arg5: memref<1x128x8xf32, #tpu.memory_space<vmem>>, %arg6: memref<128x9xf32, #tpu.memory_space<vmem>>) attributes {dimension_semantics = [#tpu.dimension_semantics<parallel>, #tpu.dimension_semantics<arbitrary>], iteration_bounds = array<i64: 4, 1>, scalar_prefetch = 0 : i64, scratch_operands = 1 : i64, tpu.core_type = #tpu.core_type<tc>, window_params = [{transform_indices = @transform_0, window_bounds = array<i64: 1, 128, 16>}, {transform_indices = @transform_1, window_bounds = array<i64: 1, 1, 128>}, {pipeline_mode = #tpu.pipeline_mode<synchronous>, transform_indices = @transform_2, window_bounds = array<i64: 16, 9>}, {transform_indices = @transform_3, window_bounds = array<i64: 1, 128, 8>}]} {
    %c0_i32 = arith.constant 0 : i32
    %0 = arith.cmpi eq, %arg1, %c0_i32 : i32
    %1 = arith.extui %0 : i1 to i32
    %c0_i32_0 = arith.constant 0 : i32
    %2 = arith.cmpi ne, %1, %c0_i32_0 : i32
    scf.if %2 {
      %c0_16 = arith.constant 0 : index
      %c0_17 = arith.constant 0 : index
      %44 = vector.load %arg4[%c0_16, %c0_17] : memref<16x9xf32, #tpu.memory_space<vmem>>, vector<16x9xf32>
      %c0_i32_18 = arith.constant 0 : i32
      %c0_i32_19 = arith.constant 0 : i32
      %c1_i32 = arith.constant 1 : i32
      %45 = arith.muli %c0_i32_19, %c1_i32 : i32
      %c0_i32_20 = arith.constant 0 : i32
      %46 = arith.addi %c0_i32_20, %45 : i32
      %c128_i32_21 = arith.constant 128 : i32
      %47 = arith.muli %46, %c128_i32_21 : i32
      %48 = tpu.assume_multiple %47, 128 : i32
      %c0_i32_22 = arith.constant 0 : i32
      %c0_i32_23 = arith.constant 0 : i32
      %49 = tpu.memref_slice %arg2[%c0_i32_18, %c0_i32_22, %c0_i32_23] : memref<1x128x16xf32, #tpu.memory_space<vmem>> -> memref<1x128x16xf32, #tpu.memory_space<vmem>>
      %50 = tpu.memref_squeeze %49 : memref<1x128x16xf32, #tpu.memory_space<vmem>> -> memref<128x16xf32, #tpu.memory_space<vmem>>
      %51 = arith.index_cast %48 : i32 to index
      %c0_24 = arith.constant 0 : index
      %52 = vector.load %50[%51, %c0_24] : memref<128x16xf32, #tpu.memory_space<vmem>>, vector<128x16xf32>
      %cst_25 = arith.constant dense<0.000000e+00> : vector<128x9xf32>
      %53 = tpu.matmul %52, %44, %cst_25 {dimension_numbers = #tpu.dot_dimension_numbers<[1], [0], [0], [1], [0, 0, 1, 1], [], []>} : vector<128x16xf32>, vector<16x9xf32>, vector<128x9xf32> -> vector<128x9xf32>
      %54 = arith.index_cast %48 : i32 to index
      %c0_26 = arith.constant 0 : index
      %55 = vector.load %arg6[%54, %c0_26] : memref<128x9xf32, #tpu.memory_space<vmem>>, vector<128x9xf32>
      tpu.vector_store %arg6[%54, %c0_26], %53 {strides = array<i32>} : memref<128x9xf32, #tpu.memory_space<vmem>>, vector<128x9xf32>,
      %c1_i32_27 = arith.constant 1 : i32
    } else {
    }
    %c128_i32 = arith.constant 128 : i32
    %3 = arith.muli %arg1, %c128_i32 : i32
    %4 = tpu.assume_multiple %3, 128 : i32
    %5 = arith.index_cast %4 : i32 to index
    %c0 = arith.constant 0 : index
    %6 = vector.load %arg6[%5, %c0] : memref<128x9xf32, #tpu.memory_space<vmem>>, vector<128x9xf32>
    %7 = vector.extract_strided_slice %6 {offsets = [0, 8], sizes = [128, 1], strides = [1, 1]} : vector<128x9xf32> to vector<128x1xf32>
    %c0_1 = arith.constant 0 : index
    %c0_2 = arith.constant 0 : index
    %c0_3 = arith.constant 0 : index
    %8 = vector.load %arg3[%c0_1, %c0_2, %c0_3] : memref<1x1x128xf32, #tpu.memory_space<vmem>>, vector<1x1x128xf32>
    %9 = vector.shape_cast %8 : vector<1x1x128xf32> to vector<1x128xf32>
    %10 = vector.broadcast %7 : vector<128x1xf32> to vector<128x128xf32>
    %11 = vector.broadcast %9 : vector<1x128xf32> to vector<128x128xf32>
    %12 = arith.addf %10, %11 : vector<128x128xf32>
    %cst = arith.constant 0.000000e+00 : f32
    %13 = vector.broadcast %cst : f32 to vector<128x128xf32>
    %14 = arith.cmpf ogt, %12, %13 : vector<128x128xf32>
    %cst_4 = arith.constant 2.000000e-01 : f32
    %15 = vector.broadcast %cst_4 : f32 to vector<128x128xf32>
    %16 = arith.mulf %15, %12 : vector<128x128xf32>
    %17 = arith.select %14, %12, %16 : vector<128x128xi1>, vector<128x128xf32>
    %cst_5 = arith.constant dense<0xFF800000> : vector<128xf32>
    %18 = vector.multi_reduction <maximumf>, %17, %cst_5 [1] : vector<128x128xf32> to vector<128xf32>
    %19 = vector.shape_cast %18 : vector<128xf32> to vector<128x1xf32>
    %20 = vector.broadcast %19 : vector<128x1xf32> to vector<128x128xf32>
    %21 = arith.subf %17, %20 : vector<128x128xf32>
    %22 = math.exp %21 : vector<128x128xf32>
    %cst_6 = arith.constant dense<0.000000e+00> : vector<128xf32>
    %23 = vector.multi_reduction <add>, %22, %cst_6 [1] : vector<128x128xf32> to vector<128xf32>
    %24 = vector.shape_cast %23 : vector<128xf32> to vector<128x1xf32>
    %c0_7 = arith.constant 0 : index
    %c0_8 = arith.constant 0 : index
    %25 = vector.load %arg6[%c0_7, %c0_8] : memref<128x9xf32, #tpu.memory_space<vmem>>, vector<128x9xf32>
    %cst_9 = arith.constant dense<0.000000e+00> : vector<128x9xf32>
    %26 = tpu.matmul %22, %25, %cst_9 {dimension_numbers = #tpu.dot_dimension_numbers<[1], [0], [0], [1], [0, 0, 1, 1], [], []>} : vector<128x128xf32>, vector<128x9xf32>, vector<128x9xf32> -> vector<128x9xf32>
    %27 = tpu.reciprocal %24 {approx = true} : vector<128x1xf32> -> vector<128x1xf32>
    %28 = arith.mulf %24, %27 : vector<128x1xf32>
    %cst_10 = arith.constant 2.000000e+00 : f32
    %29 = vector.broadcast %cst_10 : f32 to vector<128x1xf32>
    %30 = arith.subf %29, %28 : vector<128x1xf32>
    %31 = arith.mulf %27, %30 : vector<128x1xf32>
    %32 = vector.extract_strided_slice %26 {offsets = [0, 0], sizes = [128, 8], strides = [1, 1]} : vector<128x9xf32> to vector<128x8xf32>
    %33 = vector.broadcast %31 : vector<128x1xf32> to vector<128x8xf32>
    %34 = arith.mulf %32, %33 : vector<128x8xf32>
    %cst_11 = arith.constant 0.000000e+00 : f32
    %35 = vector.broadcast %cst_11 : f32 to vector<128x8xf32>
    %36 = arith.cmpf ogt, %34, %35 : vector<128x8xf32>
    %37 = math.exp %34 : vector<128x8xf32>
    %cst_12 = arith.constant 1.000000e+00 : f32
    %38 = vector.broadcast %cst_12 : f32 to vector<128x8xf32>
    %39 = arith.subf %37, %38 : vector<128x8xf32>
    %40 = arith.select %36, %34, %39 : vector<128x8xi1>, vector<128x8xf32>
    %c0_13 = arith.constant 0 : index
    %c0_14 = arith.constant 0 : index
    %c0_15 = arith.constant 0 : index
    %41 = vector.load %arg5[%c0_13, %c0_14, %c0_15] : memref<1x128x8xf32, #tpu.memory_space<vmem>>, vector<1x128x8xf32>
    %42 = vector.shape_cast %41 : vector<1x128x8xf32> to vector<128x8xf32>
    %43 = vector.shape_cast %40 : vector<128x8xf32> to vector<1x128x8xf32>
    tpu.vector_store %arg5[%c0_13, %c0_14, %c0_15], %43 {strides = array<i32>} : memref<1x128x8xf32, #tpu.memory_space<vmem>>, vector<1x128x8xf32>,
    return
  }
  func.func @transform_0(%arg0: i32, %arg1: i32) -> (i32, i32, i32) {
    %c0_i32 = arith.constant 0 : i32
    %c0_i32_0 = arith.constant 0 : i32
    %c0_i32_1 = arith.constant 0 : i32
    return %arg0, %c0_i32, %c0_i32_0 : i32, i32, i32
  }
  func.func @transform_1(%arg0: i32, %arg1: i32) -> (i32, i32, i32) {
    %c0_i32 = arith.constant 0 : i32
    %c0_i32_0 = arith.constant 0 : i32
    %c0_i32_1 = arith.constant 0 : i32
    return %arg0, %c0_i32, %c0_i32_0 : i32, i32, i32
  }
  func.func @transform_2(%arg0: i32, %arg1: i32) -> (i32, i32) {
    %c0_i32 = arith.constant 0 : i32
    %c0_i32_0 = arith.constant 0 : i32
    %c0_i32_1 = arith.constant 0 : i32
    return %c0_i32, %c0_i32_0 : i32, i32
  }
  func.func @transform_3(%arg0: i32, %arg1: i32) -> (i32, i32, i32) {
    %c0_i32 = arith.constant 0 : i32
    %c0_i32_0 = arith.constant 0 : i32
    return %arg0, %arg1, %c0_i32 : i32, i32, i32
  }
}

</mosaic_0001>

<bundles_post_ra>
// kernel: tpu_custom_call.1
= control target key start
LH: loop header
LB: loop body
LE: loop exit
PB: predicated region body
PF: predicated region fallthrough
CT: control target
= control target key end

     0   :  { %s1552_s12 = smov 0   ;;  %s1554_s13 = smov 0   ;;  %s1855_s0 = inlined_call_operand.vmem [shape: f32[4,128,16], index: 0, kind: input, shape index: {}]   ;;  %s1856_s1 = inlined_call_operand.vmem [shape: f32[4,1,128], index: 1, kind: input, shape index: {}]   ;;  %s1857_s2 = inlined_call_operand.vmem [shape: f32[16,9], index: 2, kind: input, shape index: {}]   ;;  %s1858_s3 = inlined_call_operand.vmem [shape: f32[4,128,8], index: 3, kind: output, shape index: {}]  }
   0x1   :  { %s1556_s14 = smov 0  }
   0x2 LB: > { %s25_s15 = sadd.s32 1, %s1525_s13  ;;  %p1156_p0 = scmp.ge.s32.totalorder %s1529_s14, 1  ;;  %s1529_s14 = sphi %s1556_s14, %s13_s14   ;;  %s1525_s13 = sphi %s1554_s13, %s1860_s13   ;;  %s1521_s12 = sphi %s1552_s12, %s1859_s12  }
   0x3   : > { %p27_p1 = scmp.ge.s32.totalorder %s25_s15, 4  ;;  %p159_p2 = scmp.lt.s32.totalorder %s1529_s14, 5 }
   0x5   : > { %s1862_s15 = smov (%p27_p1, %s25_s15), 0  ;;  %p160_p3 = pnand %p1156_p0, %p159_p2 }
   0x6   : > { %v212_v0 = vld [vmem:[%s1857_s2] sm:$0xff] (!%p160_p3)  ;;  %v213_v1 = vld [vmem:[%s1857_s2 + $0x8] sm:$0xff] (!%p160_p3)  ;;  %p190_p4 = scmp.lt.s32.totalorder (!%p160_p3), %s1521_s12, 3  ;;  %vm230_vm0 = vcmask (!%p160_p3), 130048   ;;  %v1531_v19 = vmov (!%p160_p3), 8   ;;  %vm424_vm1 = vcmask (!%p160_p3), 72704  }
   0x7   : > { %163 = sbr.rel (%p160_p3) target bundleno = 810 (0x32a), region = 32  ;;  %v1332_v2 = vpack.c.bf16 (!%p160_p3), %v213_v1, %v212_v0  ;;  %1409 = vset.pattern.permute.xlu0 (!%p160_p3), %v1531_v19  ;;  %1410 = vset.pattern.permute.xlu1 (!%p160_p3), %v1531_v19 }
   0x9   : > { %1333 = vmatprep.subr.bf16.mxu0 (!%p160_p3), %v1332_v2 }
   0xa   : > { %1335 = vmatpush3.bf16.msra.mxu0 (!%p160_p3), %v1332_v2 }
   0xe   : > { %s1864_s12 = smov (!%p190_p4, %s1521_s12), 3 }
   0xf   : > { %s1196_s20 = sshll.u32 %s1864_s12, 7  ;;  %s197_s26 = scalar_lea.vmem %s1856_s1, %s1864_s12 }
  0x10   : > { %s1584_s23 = scalar_lea.vmem %s1855_s0, %s1196_s20  ;;  %v1638_v60 = vld [vmem:[%s197_s26] ss:$0 sm:$0xff]  ;;  %s1751_s29 = scalar_lea.vmem %s1858_s3, %s1196_s20 }
  0x11   : > { %v214_v3 = vld [vmem:[%s1584_s23] sm:$0xff]  ;;  %v215_v4 = vld [vmem:[%s1584_s23 + $0x8] sm:$0xff]  ;;  %v216_v5 = vld [vmem:[%s1584_s23 + $0x10] sm:$0xff] }
  0x12   : > { %1252 = vmatprep.mubr.msk.f32.mxu0 %vm230_vm0, %v214_v3  ;;  %v217_v6 = vld [vmem:[%s1584_s23 + $0x18] sm:$0xff]  ;;  %v218_v7 = vld [vmem:[%s1584_s23 + $0x20] sm:$0xff]  ;;  %v219_v8 = vld [vmem:[%s1584_s23 + $0x28] sm:$0xff] }
  0x13   : > { %1253 = vmatmul.mubr.msk.f32.vlgmr.msra.gmra.mrb[0].mxu0 %vm230_vm0, %v215_v4  ;;  %v220_v9 = vld [vmem:[%s1584_s23 + $0x30] sm:$0xff]  ;;  %v221_v10 = vld [vmem:[%s1584_s23 + $0x38] sm:$0xff]  ;;  %v222_v11 = vld [vmem:[%s1584_s23 + $0x40] sm:$0xff] }
  0x14   : > { %1255 = vmatprep.mubr.msk.f32.mxu0 %vm230_vm0, %v216_v5  ;;  %v223_v12 = vld [vmem:[%s1584_s23 + $0x48] sm:$0xff]  ;;  %v224_v13 = vld [vmem:[%s1584_s23 + $0x50] sm:$0xff]  ;;  %v225_v14 = vld [vmem:[%s1584_s23 + $0x58] sm:$0xff] }
  0x15   : > { %v226_v15 = vld [vmem:[%s1584_s23 + $0x60] sm:$0xff]  ;;  %v227_v16 = vld [vmem:[%s1584_s23 + $0x68] sm:$0xff]  ;;  %v228_v17 = vld [vmem:[%s1584_s23 + $0x70] sm:$0xff] }
  0x16   : > { %v229_v18 = vld [vmem:[%s1584_s23 + $0x78] sm:$0xff] }
  0x17   : > { %1256 = vmatmul.mubr.msk.f32.gmra.mrb[2].mxu0 %vm230_vm0, %v217_v6 }
  0x18   : > { %1258 = vmatprep.mubr.msk.f32.mxu0 %vm230_vm0, %v218_v7 }
  0x1b   : > { %1259 = vmatmul.mubr.msk.f32.gmra.mrb[4].mxu0 %vm230_vm0, %v219_v8 }
  0x1c   : > { %1261 = vmatprep.mubr.msk.f32.mxu0 %vm230_vm0, %v220_v9 }
  0x1f   : > { %1262 = vmatmul.mubr.msk.f32.gmra.mrb[6].mxu0 %vm230_vm0, %v221_v10 }
  0x20   : > { %1264 = vmatprep.mubr.msk.f32.mxu0 %vm230_vm0, %v222_v11 }
  0x23   : > { %1265 = vmatmul.mubr.msk.f32.gmra.mrb[8].mxu0 %vm230_vm0, %v223_v12 }
  0x24   : > { %1267 = vmatprep.mubr.msk.f32.mxu0 %vm230_vm0, %v224_v13 }
  0x27   : > { %1268 = vmatmul.mubr.msk.f32.gmra.mrb[10].mxu0 %vm230_vm0, %v225_v14 }
  0x28   : > { %1270 = vmatprep.mubr.msk.f32.mxu0 %vm230_vm0, %v226_v15 }
  0x2b   : > { %1271 = vmatmul.mubr.msk.f32.gmra.mrb[12].mxu0 %vm230_vm0, %v227_v16 }
  0x2c   : > { %1273 = vmatprep.mubr.msk.f32.mxu0 %vm230_vm0, %v228_v17 }
  0x2f   : > { %1274 = vmatmul.mubr.msk.f32.gmra.mrb[14].mxu0 %vm230_vm0, %v229_v18 }
  0xe6   : > { %v1254_v20 = vpop.f32.mrb[0].mxu0 }
  0xe7   : > { %426 = vst.msk [vmem:[#allocation2 + $0x8] sm:$0xff] %vm424_vm1, %v1254_v20  ;;  %v345_v21 = vpop.f32.mrb[1].mxu0 }
  0xe8   : > { %425 = vst.msk [vmem:[#allocation2] sm:$0xff] %vm424_vm1, %v345_v21 }
  0xea   : > { %v1257_v22 = vpop.f32.mrb[2].mxu0 }
  0xeb   : > { %428 = vst.msk [vmem:[#allocation2 + $0x18] sm:$0xff] %vm424_vm1, %v1257_v22  ;;  %v355_v23 = vpop.f32.mrb[3].mxu0 }
  0xec   : > { %427 = vst.msk [vmem:[#allocation2 + $0x10] sm:$0xff] %vm424_vm1, %v355_v23 }
  0xee   : > { %v1260_v24 = vpop.f32.mrb[4].mxu0  ;;  %v444_v25 = vld [vmem:[#allocation2 + $0x8] sm:$0xff] }
  0xef   : > { %430 = vst.msk [vmem:[#allocation2 + $0x28] sm:$0xff] %vm424_vm1, %v1260_v24  ;;  %467 = vperm.xlu0 %1409, %v444_v25   ;;  %v365_v26 = vpop.f32.mrb[5].mxu0  ;;  %v722_v27 = vld [vmem:[#allocation2] sm:$0xff] }
  0xf0   : > { %429 = vst.msk [vmem:[#allocation2 + $0x20] sm:$0xff] %vm424_vm1, %v365_v26  ;;  %v1336_v28 = vpack.c.bf16 %v444_v25, %v722_v27 }
  0xf2   : > { %v1263_v29 = vpop.f32.mrb[6].mxu0  ;;  %1337 = vmatprep.subr.bf16.mxu0 %v1336_v28  ;;  %1368 = vmatprep.subr.bf16.mxu1 %v1336_v28  ;;  %v725_v30 = vld [vmem:[#allocation2 + $0x18] sm:$0xff] }
  0xf3   : > { %432 = vst.msk [vmem:[#allocation2 + $0x38] sm:$0xff] %vm424_vm1, %v1263_v29  ;;  %1339 = vmatpush3.bf16.msra.mxu0 %v1336_v28  ;;  %1376 = vmatpush3.bf16.msra.mxu1 %v1336_v28  ;;  %v375_v31 = vpop.f32.mrb[7].mxu0  ;;  %v724_v32 = vld [vmem:[#allocation2 + $0x10] sm:$0xff] }
  0xf4   : > { %462 = vperm.xlu0 %1409, %v722_v27   ;;  %431 = vst.msk [vmem:[#allocation2 + $0x30] sm:$0xff] %vm424_vm1, %v375_v31  ;;  %v1340_v33 = vpack.c.bf16 %v725_v30, %v724_v32 }
  0xf6   : > { %v1266_v34 = vpop.f32.mrb[8].mxu0  ;;  %1341 = vmatprep.subr.bf16.mxu0 %v1340_v33  ;;  %1369 = vmatprep.subr.bf16.mxu1 %v1340_v33  ;;  %v727_v35 = vld [vmem:[#allocation2 + $0x28] sm:$0xff] }
  0xf7   : > { %434 = vst.msk [vmem:[#allocation2 + $0x48] sm:$0xff] %vm424_vm1, %v1266_v34  ;;  %1343 = vmatpush3.bf16.msra.mxu0 %v1340_v33  ;;  %1377 = vmatpush3.bf16.msra.mxu1 %v1340_v33  ;;  %v385_v36 = vpop.f32.mrb[9].mxu0  ;;  %v726_v37 = vld [vmem:[#allocation2 + $0x20] sm:$0xff] }
  0xf8   : > { %472 = vperm.xlu0 %1409, %v724_v32   ;;  %433 = vst.msk [vmem:[#allocation2 + $0x40] sm:$0xff] %vm424_vm1, %v385_v36  ;;  %v1344_v38 = vpack.c.bf16 %v727_v35, %v726_v37 }
  0xfa   : > { %1345 = vmatprep.subr.bf16.mxu0 %v1344_v38  ;;  %1370 = vmatprep.subr.bf16.mxu1 %v1344_v38  ;;  %v450_v39 = vld [vmem:[#allocation2 + $0x38] sm:$0xff]  ;;  %v1269_v40 = vpop.f32.mrb[10].mxu0 }
  0xfb   : > { %1347 = vmatpush3.bf16.msra.mxu0 %v1344_v38  ;;  %1378 = vmatpush3.bf16.msra.mxu1 %v1344_v38  ;;  %436 = vst.msk [vmem:[#allocation2 + $0x58] sm:$0xff] %vm424_vm1, %v1269_v40  ;;  %v728_v41 = vld [vmem:[#allocation2 + $0x30] sm:$0xff]  ;;  %v395_v42 = vpop.f32.mrb[11].mxu0 }
  0xfc   : > { %497 = vperm.xlu0 %1409, %v450_v39   ;;  %v1348_v43 = vpack.c.bf16 %v450_v39, %v728_v41  ;;  %435 = vst.msk [vmem:[#allocation2 + $0x50] sm:$0xff] %vm424_vm1, %v395_v42 }
  0xfe   : > { %1349 = vmatprep.subr.bf16.mxu0 %v1348_v43  ;;  %1371 = vmatprep.subr.bf16.mxu1 %v1348_v43  ;;  %v452_v44 = vld [vmem:[#allocation2 + $0x48] sm:$0xff]  ;;  %v1272_v45 = vpop.f32.mrb[12].mxu0 }
  0xff   : > { %1351 = vmatpush3.bf16.msra.mxu0 %v1348_v43  ;;  %1379 = vmatpush3.bf16.msra.mxu1 %v1348_v43  ;;  %v451_v46 = vld [vmem:[#allocation2 + $0x40] sm:$0xff]  ;;  %438 = vst.msk [vmem:[#allocation2 + $0x68] sm:$0xff] %vm424_vm1, %v1272_v45  ;;  %v405_v47 = vpop.f32.mrb[13].mxu0 }
 0x100   : > { %492 = vperm.xlu0 %1409, %v728_v41   ;;  %507 = vperm.xlu1 %1410, %v452_v44   ;;  %v1352_v48 = vpack.c.bf16 %v452_v44, %v451_v46  ;;  %437 = vst.msk [vmem:[#allocation2 + $0x60] sm:$0xff] %vm424_vm1, %v405_v47 }
 0x102   : > { %1353 = vmatprep.subr.bf16.mxu0 %v1352_v48  ;;  %1372 = vmatprep.subr.bf16.mxu1 %v1352_v48  ;;  %v1275_v49 = vpop.f32.mrb[14].mxu0  ;;  %v454_v50 = vld [vmem:[#allocation2 + $0x58] sm:$0xff] }
 0x103   : > { %1355 = vmatpush3.bf16.msra.mxu0 %v1352_v48  ;;  %1380 = vmatpush3.bf16.msra.mxu1 %v1352_v48  ;;  %v453_v51 = vld [vmem:[#allocation2 + $0x50] sm:$0xff]  ;;  %440 = vst.msk [vmem:[#allocation2 + $0x78] sm:$0xff] %vm424_vm1, %v1275_v49  ;;  %v415_v52 = vpop.f32.mrb[15].mxu0 }
 0x104   : > { %477 = vperm.xlu0 %1409, %v725_v30   ;;  %502 = vperm.xlu1 %1410, %v451_v46   ;;  %v1356_v53 = vpack.c.bf16 %v454_v50, %v453_v51  ;;  %439 = vst.msk [vmem:[#allocation2 + $0x70] sm:$0xff] %vm424_vm1, %v415_v52 }
 0x106   : > { %1357 = vmatprep.subr.bf16.mxu0 %v1356_v53  ;;  %1373 = vmatprep.subr.bf16.mxu1 %v1356_v53  ;;  %v456_v54 = vld [vmem:[#allocation2 + $0x68] sm:$0xff] }
 0x107   : > { %1359 = vmatpush3.bf16.msra.mxu0 %v1356_v53  ;;  %1381 = vmatpush3.bf16.msra.mxu1 %v1356_v53  ;;  %v455_v55 = vld [vmem:[#allocation2 + $0x60] sm:$0xff] }
 0x108   : > { %482 = vperm.xlu0 %1409, %v726_v37   ;;  %517 = vperm.xlu1 %1410, %v454_v50   ;;  %v1360_v56 = vpack.c.bf16 %v456_v54, %v455_v55 }
 0x10a   : > { %1361 = vmatprep.subr.bf16.mxu0 %v1360_v56  ;;  %1374 = vmatprep.subr.bf16.mxu1 %v1360_v56  ;;  %v737_v57 = vld [vmem:[#allocation2 + $0x78] sm:$0xff] }
 0x10b   : > { %1363 = vmatpush3.bf16.msra.mxu0 %v1360_v56  ;;  %1382 = vmatpush3.bf16.msra.mxu1 %v1360_v56  ;;  %v457_v58 = vld [vmem:[#allocation2 + $0x70] sm:$0xff] }
 0x10c   : > { %487 = vperm.xlu0 %1409, %v727_v35   ;;  %512 = vperm.xlu1 %1410, %v453_v51   ;;  %v1364_v59 = vpack.c.bf16 %v737_v57, %v457_v58 }
 0x10e   : > { %1365 = vmatprep.subr.bf16.mxu0 %v1364_v59  ;;  %1375 = vmatprep.subr.bf16.mxu1 %v1364_v59 }
 0x10f   : > { %1367 = vmatpush3.bf16.msra.mxu0 %v1364_v59  ;;  %1383 = vmatpush3.bf16.msra.mxu1 %v1364_v59 }
 0x110   : > { %527 = vperm.xlu1 %1410, %v456_v54  }
 0x114   : > { %522 = vperm.xlu1 %1410, %v455_v55  }
 0x118   : > { %532 = vperm.xlu1 %1410, %v457_v58  }
 0x11c   : > { %537 = vperm.xlu1 %1410, %v737_v57  }
 0x16e   : > { %v468_v61 = vpop.permute.xlu0 %467 }
 0x16f   : > { %v547_v62 = vadd.f32 %v1638_v60, %v468_v61 }
 0x171   : > { %vm563_vm2 = vcmp.gt.f32.partialorder %v547_v62, 0.0  ;;  %v579_v63 = vmul.f32 0.2, %v547_v62 }
 0x173   : > { %v463_v0 = vpop.permute.xlu0 %462  ;;  %v1641_v1 = vsel %vm563_vm2, %v547_v62, %v579_v63  ;;  %vm1043_vm2 = vcmask 64512  }
 0x174   : > { %v546_v2 = vadd.f32 %v1638_v60, %v463_v0  ;;  %612 = vmax.xlane.f32.xlu1 %v1641_v1 }
 0x176   : > { %vm562_vm3 = vcmp.gt.f32.partialorder %v546_v2, 0.0  ;;  %v578_v3 = vmul.f32 0.2, %v546_v2 }
 0x177   : > { %v473_v4 = vpop.permute.xlu0 %472 }
 0x178   : > { %v1645_v5 = vsel %vm562_vm3, %v546_v2, %v578_v3  ;;  %v548_v6 = vadd.f32 %v1638_v60, %v473_v4 }
 0x179   : > { %610 = vmax.xlane.f32.xlu1 %v1645_v5 }
 0x17a   : > { %v580_v12 = vmul.f32 0.2, %v548_v6  ;;  %vm564_vm5 = vcmp.gt.f32.partialorder %v548_v6, 0.0 }
 0x17b   : > { %v498_v7 = vpop.permute.xlu0 %497 }
 0x17c   : > { %v553_v8 = vadd.f32 %v1638_v60, %v498_v7  ;;  %v1655_v19 = vsel %vm564_vm5, %v548_v6, %v580_v12 }
 0x17e   : > { %vm569_vm4 = vcmp.gt.f32.partialorder %v553_v8, 0.0  ;;  %v585_v9 = vmul.f32 0.2, %v553_v8 }
 0x17f   : > { %v493_v10 = vpop.permute.xlu0 %492  ;;  %v508_v11 = vpop.permute.xlu1 %507 }
 0x180   : > { %v552_v13 = vadd.f32 %v1638_v60, %v493_v10  ;;  %v555_v14 = vadd.f32 %v1638_v60, %v508_v11  ;;  %v1652_v15 = vsel %vm569_vm4, %v553_v8, %v585_v9 }
 0x181   : > { %624 = vmax.xlane.f32.xlu1 %v1652_v15 }
 0x182   : > { %vm568_vm6 = vcmp.gt.f32.partialorder %v552_v13, 0.0  ;;  %v584_v16 = vmul.f32 0.2, %v552_v13  ;;  %v587_v20 = vmul.f32 0.2, %v555_v14  ;;  %vm571_vm7 = vcmp.gt.f32.partialorder %v555_v14, 0.0 }
 0x183   : > { %v478_v17 = vpop.permute.xlu0 %477  ;;  %v503_v18 = vpop.permute.xlu1 %502 }
 0x184   : > { %v549_v21 = vadd.f32 %v1638_v60, %v478_v17  ;;  %v554_v22 = vadd.f32 %v1638_v60, %v503_v18  ;;  %v1659_v23 = vsel %vm568_vm6, %v552_v13, %v584_v16  ;;  %v1663_v27 = vsel %vm571_vm7, %v555_v14, %v587_v20 }
 0x185   : > { %622 = vmax.xlane.f32.xlu0 %v1659_v23  ;;  %614 = vmax.xlane.f32.xlu1 %v1655_v19 }
 0x186   : > { %vm565_vm8 = vcmp.gt.f32.partialorder %v549_v21, 0.0  ;;  %v581_v24 = vmul.f32 0.2, %v549_v21  ;;  %v586_v28 = vmul.f32 0.2, %v554_v22  ;;  %vm570_vm9 = vcmp.gt.f32.partialorder %v554_v22, 0.0 }
 0x187   : > { %v483_v25 = vpop.permute.xlu0 %482  ;;  %v518_v26 = vpop.permute.xlu1 %517 }
 0x188   : > { %v550_v29 = vadd.f32 %v1638_v60, %v483_v25  ;;  %v557_v30 = vadd.f32 %v1638_v60, %v518_v26  ;;  %v1667_v31 = vsel %vm565_vm8, %v549_v21, %v581_v24  ;;  %v1671_v35 = vsel %vm570_vm9, %v554_v22, %v586_v28 }
 0x189   : > { %628 = vmax.xlane.f32.xlu0 %v1663_v27  ;;  %616 = vmax.xlane.f32.xlu1 %v1667_v31 }
 0x18a   : > { %vm566_vm10 = vcmp.gt.f32.partialorder %v550_v29, 0.0  ;;  %v582_v32 = vmul.f32 0.2, %v550_v29  ;;  %v589_v39 = vmul.f32 0.2, %v557_v30  ;;  %vm573_vm11 = vcmp.gt.f32.partialorder %v557_v30, 0.0 }
 0x18b   : > { %v488_v33 = vpop.permute.xlu0 %487  ;;  %v513_v34 = vpop.permute.xlu1 %512 }
 0x18c   : > { %v551_v36 = vadd.f32 %v1638_v60, %v488_v33  ;;  %v556_v37 = vadd.f32 %v1638_v60, %v513_v34  ;;  %v1675_v38 = vsel %vm566_vm10, %v550_v29, %v582_v32  ;;  %v1680_v43 = vsel %vm573_vm11, %v557_v30, %v589_v39 }
 0x18d   : > { %626 = vmax.xlane.f32.xlu0 %v1671_v35  ;;  %618 = vmax.xlane.f32.xlu1 %v1675_v38 }
 0x18e   : > { %vm567_vm12 = vcmp.gt.f32.partialorder %v551_v36, 0.0  ;;  %v583_v40 = vmul.f32 0.2, %v551_v36  ;;  %v588_v45 = vmul.f32 0.2, %v556_v37  ;;  %vm572_vm13 = vcmp.gt.f32.partialorder %v556_v37, 0.0 }
 0x18f   : > { %v528_v41 = vpop.permute.xlu1 %527 }
 0x190   : > { %v559_v42 = vadd.f32 %v1638_v60, %v528_v41  ;;  %v1682_v44 = vsel %vm567_vm12, %v551_v36, %v583_v40  ;;  %v1687_v48 = vsel %vm572_vm13, %v556_v37, %v588_v45 }
 0x191   : > { %632 = vmax.xlane.f32.xlu0 %v1680_v43  ;;  %620 = vmax.xlane.f32.xlu1 %v1682_v44 }
 0x192   : > { %v591_v49 = vmul.f32 0.2, %v559_v42  ;;  %vm575_vm14 = vcmp.gt.f32.partialorder %v559_v42, 0.0 }
 0x193   : > { %v523_v46 = vpop.permute.xlu1 %522 }
 0x194   : > { %v558_v47 = vadd.f32 %v1638_v60, %v523_v46  ;;  %v1691_v52 = vsel %vm575_vm14, %v559_v42, %v591_v49 }
 0x195   : > { %630 = vmax.xlane.f32.xlu0 %v1687_v48 }
 0x196   : > { %v590_v53 = vmul.f32 0.2, %v558_v47  ;;  %vm574_vm15 = vcmp.gt.f32.partialorder %v558_v47, 0.0 }
 0x197   : > { %v533_v50 = vpop.permute.xlu1 %532 }
 0x198   : > { %v560_v51 = vadd.f32 %v1638_v60, %v533_v50  ;;  %v1695_v56 = vsel %vm574_vm15, %v558_v47, %v590_v53 }
 0x199   : > { %636 = vmax.xlane.f32.xlu0 %v1691_v52 }
 0x19a   : > { %v592_v57 = vmul.f32 0.2, %v560_v51  ;;  %vm576_vm0 = vcmp.gt.f32.partialorder %v560_v51, 0.0 }
 0x19b   : > { %v538_v54 = vpop.permute.xlu1 %537 }
 0x19c   : > { %v561_v55 = vadd.f32 %v1638_v60, %v538_v54  ;;  %v1698_v58 = vsel %vm576_vm0, %v560_v51, %v592_v57 }
 0x19d   : > { %634 = vmax.xlane.f32.xlu0 %v1695_v56 }
 0x19e   : > { %v593_v59 = vmul.f32 0.2, %v561_v55  ;;  %vm577_vm1 = vcmp.gt.f32.partialorder %v561_v55, 0.0 }
 0x1a0   : > { %v1701_v61 = vsel %vm577_vm1, %v561_v55, %v593_v59 }
 0x1a1   : > { %638 = vmax.xlane.f32.xlu0 %v1698_v58 }
 0x1a5   : > { %640 = vmax.xlane.f32.xlu0 %v1701_v61 }
 0x201   : > { %v613_v62 = vpop.xlane.xlu1 %612 }
 0x202   : > { %v643_v63 = vsub.f32 %v1641_v1, %v613_v62 }
 0x204   : > { %v660_v60 = vmul.f32 1.442695, %v643_v63 }
 0x206   : > { %1411 = vpow2.f32 %v660_v60  ;;  %v611_v0 = vpop.xlane.xlu1 %610 }
 0x207   : > { %v642_v2 = vsub.f32 %v1645_v5, %v611_v0 }
 0x209   : > { %v658_v3 = vmul.f32 1.442695, %v642_v2 }
 0x20b   : > { %1413 = vpow2.f32 %v658_v3 }
 0x20e   : > { %v625_v4 = vpop.xlane.xlu1 %624 }
 0x20f   : > { %v649_v7 = vsub.f32 %v1652_v15, %v625_v4 }
 0x210   : > { %v1412_v6 = vpop.eup %1411 }
 0x211   : > { %692 = vadd.xlane.f32.xlu0 %v1412_v6  ;;  %v672_v1 = vmul.f32 1.442695, %v649_v7 }
 0x212   : > { %v623_v8 = vpop.xlane.xlu0 %622  ;;  %v615_v9 = vpop.xlane.xlu1 %614 }
 0x213   : > { %v648_v10 = vsub.f32 %v1659_v23, %v623_v8  ;;  %v644_v11 = vsub.f32 %v1655_v19, %v615_v9 }
 0x215   : > { %v1414_v12 = vpop.eup %1413  ;;  %v670_v13 = vmul.f32 1.442695, %v648_v10  ;;  %v662_v14 = vmul.f32 1.442695, %v644_v11 }
 0x216   : > { %v629_v16 = vpop.xlane.xlu0 %628  ;;  %690 = vadd.xlane.f32.xlu1 %v1414_v12  ;;  %1308 = vmatprep.mubr.f32.mxu0 %v1414_v12  ;;  %v617_v5 = vpop.xlane.xlu1 %616 }
 0x217   : > { %1415 = vpow2.f32 %v670_v13  ;;  %v645_v17 = vsub.f32 %v1667_v31, %v617_v5  ;;  %1309 = vmatmul.mubr.f32.vlgmr.msra.gmra.mrb[16].mxu0 %v1412_v6  ;;  %v651_v15 = vsub.f32 %v1663_v27, %v629_v16 }
 0x218   : > { %1417 = vpow2.f32 %v662_v14 }
 0x219   : > { %1419 = vpow2.f32 %v672_v1  ;;  %v664_v18 = vmul.f32 1.442695, %v645_v17  ;;  %v676_v23 = vmul.f32 1.442695, %v651_v15 }
 0x21a   : > { %v627_v20 = vpop.xlane.xlu0 %626  ;;  %v619_v21 = vpop.xlane.xlu1 %618 }
 0x21b   : > { %v650_v19 = vsub.f32 %v1671_v35, %v627_v20  ;;  %v646_v22 = vsub.f32 %v1675_v38, %v619_v21  ;;  %1421 = vpow2.f32 %v664_v18 }
 0x21d   : > { %v674_v24 = vmul.f32 1.442695, %v650_v19  ;;  %v666_v25 = vmul.f32 1.442695, %v646_v22 }
 0x21e   : > { %v633_v26 = vpop.xlane.xlu0 %632  ;;  %v621_v28 = vpop.xlane.xlu1 %620 }
 0x21f   : > { %1423 = vpow2.f32 %v674_v24  ;;  %v647_v29 = vsub.f32 %v1682_v44, %v621_v28  ;;  %v653_v27 = vsub.f32 %v1680_v43, %v633_v26 }
 0x220   : > { %1425 = vpow2.f32 %v666_v25 }
 0x221   : > { %v1416_v30 = vpop.eup %1415  ;;  %1427 = vpow2.f32 %v676_v23  ;;  %v668_v31 = vmul.f32 1.442695, %v647_v29  ;;  %v680_v36 = vmul.f32 1.442695, %v653_v27 }
 0x222   : > { %v1418_v32 = vpop.eup %1417  ;;  %1317 = vmatprep.mubr.f32.mxu1 %v1416_v30  ;;  %v631_v33 = vpop.xlane.xlu0 %630 }
 0x223   : > { %v1420_v34 = vpop.eup %1419  ;;  %v652_v35 = vsub.f32 %v1687_v48, %v631_v33  ;;  %694 = vadd.xlane.f32.xlu1 %v1418_v32  ;;  %1311 = vmatprep.mubr.f32.mxu0 %v1418_v32  ;;  %1429 = vpow2.f32 %v668_v31 }
 0x224   : > { %1318 = vmatmul.mubr.f32.vlgmr.msra.gmra.mrb[0].mxu1 %v1420_v34 }
 0x225   : > { %v678_v37 = vmul.f32 1.442695, %v652_v35  ;;  %v1422_v38 = vpop.eup %1421 }
 0x226   : > { %v637_v39 = vpop.xlane.xlu0 %636  ;;  %696 = vadd.xlane.f32.xlu0 %v1422_v38  ;;  %1312 = vmatmul.mubr.f32.gmra.mrb[18].mxu0 %v1422_v38 }
 0x227   : > { %1431 = vpow2.f32 %v678_v37  ;;  %v655_v41 = vsub.f32 %v1691_v52, %v637_v39 }
 0x228   : > { %1433 = vpow2.f32 %v680_v36 }
 0x229   : > { %v1424_v40 = vpop.eup %1423  ;;  %v684_v46 = vmul.f32 1.442695, %v655_v41 }
 0x22a   : > { %v1426_v42 = vpop.eup %1425  ;;  %v635_v43 = vpop.xlane.xlu0 %634  ;;  %1320 = vmatprep.mubr.f32.mxu1 %v1424_v40 }
 0x22b   : > { %v1428_v44 = vpop.eup %1427  ;;  %v654_v45 = vsub.f32 %v1695_v56, %v635_v43  ;;  %698 = vadd.xlane.f32.xlu1 %v1426_v42  ;;  %1314 = vmatprep.mubr.f32.mxu0 %v1426_v42 }
 0x22c   : > { %1321 = vmatmul.mubr.f32.gmra.mrb[2].mxu1 %v1428_v44 }
 0x22d   : > { %v682_v47 = vmul.f32 1.442695, %v654_v45  ;;  %v1430_v48 = vpop.eup %1429 }
 0x22e   : > { %v639_v49 = vpop.xlane.xlu0 %638  ;;  %700 = vadd.xlane.f32.xlu0 %v1430_v48  ;;  %1315 = vmatmul.mubr.f32.gmra.mrb[20].mxu0 %v1430_v48 }
 0x22f   : > { %1435 = vpow2.f32 %v682_v47  ;;  %v656_v50 = vsub.f32 %v1698_v58, %v639_v49  ;;  %702 = vadd.xlane.f32.xlu1 %v1416_v30 }
 0x230   : > { %1437 = vpow2.f32 %v684_v46 }
 0x231   : > { %v1432_v51 = vpop.eup %1431  ;;  %v686_v52 = vmul.f32 1.442695, %v656_v50 }
 0x232   : > { %v641_v53 = vpop.xlane.xlu0 %640  ;;  %1323 = vmatprep.mubr.f32.mxu1 %v1432_v51  ;;  %v1434_v54 = vpop.eup %1433  ;;  %704 = vadd.xlane.f32.xlu0 %v1420_v34 }
 0x233   : > { %1439 = vpow2.f32 %v686_v52  ;;  %v657_v55 = vsub.f32 %v1701_v61, %v641_v53  ;;  %706 = vadd.xlane.f32.xlu1 %v1424_v40  ;;  %1324 = vmatmul.mubr.f32.gmra.mrb[4].mxu1 %v1434_v54 }
 0x235   : > { %v688_v56 = vmul.f32 1.442695, %v657_v55 }
 0x236   : > { %708 = vadd.xlane.f32.xlu0 %v1428_v44 }
 0x237   : > { %1441 = vpow2.f32 %v688_v56  ;;  %710 = vadd.xlane.f32.xlu1 %v1432_v51 }
 0x239   : > { %v1436_v57 = vpop.eup %1435 }
 0x23a   : > { %1326 = vmatprep.mubr.f32.mxu1 %v1436_v57  ;;  %v1438_v58 = vpop.eup %1437  ;;  %712 = vadd.xlane.f32.xlu0 %v1434_v54 }
 0x23b   : > { %714 = vadd.xlane.f32.xlu1 %v1436_v57  ;;  %1327 = vmatmul.mubr.f32.gmra.mrb[6].mxu1 %v1438_v58 }
 0x23d   : > { %v1440_v59 = vpop.eup %1439 }
 0x23e   : > { %1329 = vmatprep.mubr.f32.mxu1 %v1440_v59  ;;  %716 = vadd.xlane.f32.xlu0 %v1438_v58 }
 0x23f   : > { %718 = vadd.xlane.f32.xlu1 %v1440_v59 }
 0x241   : > { %v1442_v62 = vpop.eup %1441 }
 0x242   : > { %1330 = vmatmul.mubr.f32.gmra.mrb[8].mxu1 %v1442_v62  ;;  %720 = vadd.xlane.f32.xlu0 %v1442_v62 }
 0x29e   : > { %v693_v61 = vpop.xlane.xlu0 %692 }
 0x29f   : > { %1443 = vrcp.f32 %v693_v61 }
 0x2a3   : > { %v691_v63 = vpop.xlane.xlu1 %690 }
 0x2a4   : > { %1445 = vrcp.f32 %v691_v63 }
 0x2a9   : > { %v1444_v4 = vpop.eup %1443 }
 0x2aa   : > { %v900_v9 = vmul.f32 %v1444_v4, %v693_v61 }
 0x2ac   : > { %v916_v12 = vsub.f32 2.0, %v900_v9 }
 0x2ae   : > { %v1446_v8 = vpop.eup %1445  ;;  %v932_v14 = vmul.f32 %v1444_v4, %v916_v12 }
 0x2af   : > { %v899_v10 = vmul.f32 %v1446_v8, %v691_v63 }
 0x2b0   : > { %v695_v60 = vpop.xlane.xlu1 %694 }
 0x2b1   : > { %v915_v1 = vsub.f32 2.0, %v899_v10 }
 0x2b3   : > { %v697_v0 = vpop.xlane.xlu0 %696  ;;  %v931_v17 = vmul.f32 %v1446_v8, %v915_v1 }
 0x2b8   : > { %v699_v2 = vpop.xlane.xlu1 %698 }
 0x2bb   : > { %v1720_v3 = vpop.xlane.xlu0 %700 }
 0x2bc   : > { %v703_v6 = vpop.xlane.xlu1 %702 }
 0x2bf   : > { %v705_v7 = vpop.xlane.xlu0 %704 }
 0x2c0   : > { %1447 = vrcp.f32 %v705_v7  ;;  %v707_v11 = vpop.xlane.xlu1 %706 }
 0x2c1   : > { %1449 = vrcp.f32 %v703_v6 }
 0x2c2   : > { %1451 = vrcp.f32 %v695_v60 }
 0x2c3   : > { %1453 = vrcp.f32 %v697_v0  ;;  %v709_v13 = vpop.xlane.xlu0 %708 }
 0x2c4   : > { %1455 = vrcp.f32 %v707_v11  ;;  %v1722_v16 = vpop.xlane.xlu1 %710 }
 0x2c5   : > { %1457 = vrcp.f32 %v709_v13 }
 0x2c6   : > { %1459 = vrcp.f32 %v699_v2 }
 0x2c7   : > { %1461 = vrcp.f32 %v1720_v3  ;;  %v713_v26 = vpop.xlane.xlu0 %712 }
 0x2c8   : > { %v1728_v27 = vpop.xlane.xlu1 %714 }
 0x2ca   : > { %v1448_v15 = vpop.eup %1447 }
 0x2cb   : > { %v1450_v21 = vpop.eup %1449  ;;  %v906_v25 = vmul.f32 %v1448_v15, %v705_v7  ;;  %v1733_v39 = vpop.xlane.xlu0 %716 }
 0x2cc   : > { %v1452_v22 = vpop.eup %1451  ;;  %v905_v29 = vmul.f32 %v1450_v21, %v703_v6  ;;  %v1735_v43 = vpop.xlane.xlu1 %718 }
 0x2cd   : > { %v1454_v24 = vpop.eup %1453  ;;  %v901_v30 = vmul.f32 %v1452_v22, %v695_v60  ;;  %v922_v33 = vsub.f32 2.0, %v906_v25 }
 0x2ce   : > { %v902_v31 = vmul.f32 %v1454_v24, %v697_v0  ;;  %v1456_v32 = vpop.eup %1455  ;;  %v921_v35 = vsub.f32 2.0, %v905_v29 }
 0x2cf   : > { %v1458_v34 = vpop.eup %1457  ;;  %v917_v36 = vsub.f32 2.0, %v901_v30  ;;  %v907_v41 = vmul.f32 %v1456_v32, %v707_v11  ;;  %v938_v44 = vmul.f32 %v1448_v15, %v922_v33  ;;  %v1754_v63 = vpop.xlane.xlu0 %720 }
 0x2d0   : > { %v1731_v37 = vpop.eup %1459  ;;  %v918_v38 = vsub.f32 2.0, %v902_v31  ;;  %v908_v42 = vmul.f32 %v1458_v34, %v709_v13  ;;  %v937_v46 = vmul.f32 %v1450_v21, %v921_v35 }
 0x2d1   : > { %v1462_v40 = vpop.eup %1461  ;;  %v903_v47 = vmul.f32 %v1731_v37, %v699_v2  ;;  %v933_v50 = vmul.f32 %v1452_v22, %v917_v36  ;;  %v923_v56 = vsub.f32 2.0, %v907_v41 }
 0x2d2   : > { %v904_v52 = vmul.f32 %v1462_v40, %v1720_v3  ;;  %v934_v54 = vmul.f32 %v1454_v24, %v918_v38  ;;  %v924_v57 = vsub.f32 2.0, %v908_v42 }
 0x2d3   : > { %v919_v13 = vsub.f32 2.0, %v903_v47 }
 0x2d4   : > { %v920_v8 = vsub.f32 2.0, %v904_v52  ;;  %v940_v1 = vmul.f32 %v1458_v34, %v924_v57 }
 0x2d5   : > { %v935_v29 = vmul.f32 %v1731_v37, %v919_v13 }
 0x2d6   : > { %v936_v24 = vmul.f32 %v1462_v40, %v920_v8 }
 0x2ea   : > { %v1310_v5 = vpop.f32.mrb[16].mxu0 }
 0x2eb   : > { %v948_v18 = vmul.f32 %v1310_v5, %v932_v14  ;;  %v804_v20 = vpop.f32.mrb[17].mxu0 }
 0x2ec   : > { %v1725_v19 = vmul.f32 %v931_v17, %v804_v20  ;;  %v939_v17 = vmul.f32 %v1456_v32, %v923_v56 }
 0x2ed   : > { %v981_v23 = vmul.f32 1.442695, %v948_v18  ;;  %vm964_vm3 = vcmp.gt.f32.partialorder %v948_v18, 0.0 }
 0x2ee   : > { %v979_v28 = vmul.f32 1.442695, %v1725_v19  ;;  %vm963_vm4 = vcmp.gt.f32.partialorder %v1725_v19, 0.0 }
 0x2ef   : > { %1463 = vpow2.f32 %v981_v23 }
 0x2f0   : > { %1465 = vpow2.f32 %v979_v28 }
 0x2f1   : > { %1467 = vrcp.f32 %v713_v26 }
 0x2f2   : > { %1469 = vrcp.f32 %v1722_v16 }
 0x2f3   : > { %1471 = vrcp.f32 %v1728_v27 }
 0x2f4   : > { %1473 = vrcp.f32 %v1733_v39 }
 0x2f5   : > { %1475 = vrcp.f32 %v1735_v43 }
 0x2f7   : > { %v1319_v45 = vpop.f32.mrb[0].mxu1 }
 0x2f8   : > { %v1740_v48 = vmul.f32 %v1319_v45, %v938_v44  ;;  %v834_v49 = vpop.f32.mrb[1].mxu1 }
 0x2f9   : > { %v1464_v51 = vpop.eup %1463  ;;  %v1744_v53 = vmul.f32 %v937_v46, %v834_v49  ;;  %v1313_v62 = vpop.f32.mrb[18].mxu0 }
 0x2fa   : > { %v1466_v55 = vpop.eup %1465  ;;  %v1179_v58 = vadd.f32 -1.0, %v1464_v51  ;;  %v993_v59 = vmul.f32 1.442695, %v1740_v48  ;;  %v1757_v2 = vmul.f32 %v1313_v62, %v934_v54  ;;  %v814_v3 = vpop.f32.mrb[19].mxu0  ;;  %vm970_vm5 = vcmp.gt.f32.partialorder %v1740_v48, 0.0 }
 0x2fb   : > { %v1468_v61 = vpop.eup %1467  ;;  %v1178_v60 = vadd.f32 -1.0, %v1466_v55  ;;  %v991_v0 = vmul.f32 1.442695, %v1744_v53  ;;  %v1760_v7 = vmul.f32 %v933_v50, %v814_v3  ;;  %vm969_vm6 = vcmp.gt.f32.partialorder %v1744_v53, 0.0 }
 0x2fc   : > { %v1470_v4 = vpop.eup %1469  ;;  %v1028_v6 = vsel %vm964_vm3, %v948_v18, %v1179_v58  ;;  %1477 = vpow2.f32 %v993_v59  ;;  %v985_v10 = vmul.f32 1.442695, %v1757_v2  ;;  %v910_v11 = vmul.f32 %v1468_v61, %v713_v26 }
 0x2fd   : > { %1045 = vst.msk [vmem:[%s1751_s29 + $0x8] sm:$0xff] %vm1043_vm2, %v1028_v6  ;;  %v1027_v9 = vsel %vm963_vm4, %v1725_v19, %v1178_v60  ;;  %1479 = vpow2.f32 %v991_v0  ;;  %v983_v12 = vmul.f32 1.442695, %v1760_v7  ;;  %v909_v14 = vmul.f32 %v1470_v4, %v1722_v16  ;;  %v1472_v20 = vpop.eup %1471 }
 0x2fe   : > { %1481 = vrcp.f32 %v1754_v63  ;;  %1044 = vst.msk [vmem:[%s1751_s29] sm:$0xff] %vm1043_vm2, %v1027_v9  ;;  %v1474_v19 = vpop.eup %1473  ;;  %v926_v22 = vsub.f32 2.0, %v910_v11  ;;  %v911_v40 = vmul.f32 %v1472_v20, %v1728_v27  ;;  %vm966_vm7 = vcmp.gt.f32.partialorder %v1757_v2, 0.0 }
 0x2ff   : > { %1483 = vpow2.f32 %v985_v10  ;;  %v1322_v5 = vpop.f32.mrb[2].mxu1  ;;  %v1776_v25 = vpop.eup %1475  ;;  %v925_v26 = vsub.f32 2.0, %v909_v14  ;;  %v912_v34 = vmul.f32 %v1474_v19, %v1733_v39  ;;  %vm965_vm8 = vcmp.gt.f32.partialorder %v1760_v7, 0.0 }
 0x300   : > { %1485 = vpow2.f32 %v983_v12  ;;  %v1771_v15 = vmul.f32 %v1322_v5, %v940_v1  ;;  %v844_v18 = vpop.f32.mrb[3].mxu1  ;;  %v942_v36 = vmul.f32 %v1468_v61, %v926_v22  ;;  %v927_v57 = vsub.f32 2.0, %v911_v40 }
 0x301   : > { %v1773_v21 = vmul.f32 %v939_v17, %v844_v18  ;;  %v1316_v28 = vpop.f32.mrb[20].mxu0  ;;  %v941_v44 = vmul.f32 %v1470_v4, %v925_v26  ;;  %v928_v52 = vsub.f32 2.0, %v912_v34 }
 0x302   : > { %v997_v23 = vmul.f32 1.442695, %v1771_v15  ;;  %v1780_v30 = vmul.f32 %v1316_v28, %v936_v24  ;;  %v824_v31 = vpop.f32.mrb[21].mxu0  ;;  %vm972_vm9 = vcmp.gt.f32.partialorder %v1771_v15, 0.0 }
 0x303   : > { %v995_v16 = vmul.f32 1.442695, %v1773_v21  ;;  %v1782_v32 = vmul.f32 %v935_v29, %v824_v31  ;;  %v944_v0 = vmul.f32 %v1474_v19, %v928_v52  ;;  %vm971_vm10 = vcmp.gt.f32.partialorder %v1773_v21, 0.0 }
 0x304   : > { %1487 = vpow2.f32 %v997_v23  ;;  %v989_v35 = vmul.f32 1.442695, %v1780_v30  ;;  %vm968_vm11 = vcmp.gt.f32.partialorder %v1780_v30, 0.0 }
 0x305   : > { %1489 = vpow2.f32 %v995_v16  ;;  %v987_v42 = vmul.f32 1.442695, %v1782_v32  ;;  %vm967_vm12 = vcmp.gt.f32.partialorder %v1782_v32, 0.0 }
 0x306   : > { %v1478_v33 = vpop.eup %1477  ;;  %v1325_v37 = vpop.f32.mrb[4].mxu1  ;;  %1491 = vpow2.f32 %v989_v35 }
 0x307   : > { %v1480_v38 = vpop.eup %1479  ;;  %v1185_v41 = vadd.f32 -1.0, %v1478_v33  ;;  %v1789_v47 = vmul.f32 %v1325_v37, %v942_v36  ;;  %v854_v39 = vpop.f32.mrb[5].mxu1  ;;  %1493 = vpow2.f32 %v987_v42 }
 0x308   : > { %v1482_v45 = vpop.eup %1481  ;;  %v1184_v46 = vadd.f32 -1.0, %v1480_v38  ;;  %v1793_v27 = vmul.f32 %v941_v44, %v854_v39 }
 0x309   : > { %v1484_v49 = vpop.eup %1483  ;;  %v1034_v50 = vsel %vm970_vm5, %v1740_v48, %v1185_v41  ;;  %v1001_v56 = vmul.f32 1.442695, %v1789_v47  ;;  %v914_v59 = vmul.f32 %v1482_v45, %v1754_v63  ;;  %vm974_vm13 = vcmp.gt.f32.partialorder %v1789_v47, 0.0 }
 0x30a   : > { %v1486_v51 = vpop.eup %1485  ;;  %1051 = vst.msk [vmem:[%s1751_s29 + $0x38] sm:$0xff] %vm1043_vm2, %v1034_v50  ;;  %v1033_v54 = vsel %vm969_vm6, %v1744_v53, %v1184_v46  ;;  %v1181_v55 = vadd.f32 -1.0, %v1484_v49  ;;  %v999_v58 = vmul.f32 1.442695, %v1793_v27  ;;  %v913_v53 = vmul.f32 %v1776_v25, %v1735_v43 }
 0x30b   : > { %1050 = vst.msk [vmem:[%s1751_s29 + $0x30] sm:$0xff] %vm1043_vm2, %v1033_v54  ;;  %v1180_v48 = vadd.f32 -1.0, %v1486_v51  ;;  %1495 = vpow2.f32 %v1001_v56  ;;  %v930_v6 = vsub.f32 2.0, %v914_v59  ;;  %vm973_vm14 = vcmp.gt.f32.partialorder %v1793_v27, 0.0 }
 0x30c   : > { %v1030_v62 = vsel %vm966_vm7, %v1757_v2, %v1181_v55  ;;  %1497 = vpow2.f32 %v999_v58  ;;  %v943_v2 = vmul.f32 %v1472_v20, %v927_v57  ;;  %v929_v10 = vsub.f32 2.0, %v913_v53 }
 0x30d   : > { %1047 = vst.msk [vmem:[%s1751_s29 + $0x18] sm:$0xff] %vm1043_vm2, %v1030_v62  ;;  %v1029_v61 = vsel %vm965_vm8, %v1760_v7, %v1180_v48 }
 0x30e   : > { %v1488_v60 = vpop.eup %1487  ;;  %1046 = vst.msk [vmem:[%s1751_s29 + $0x10] sm:$0xff] %vm1043_vm2, %v1029_v61  ;;  %v1328_v4 = vpop.f32.mrb[6].mxu1 }
 0x30f   : > { %v1490_v3 = vpop.eup %1489  ;;  %v1187_v63 = vadd.f32 -1.0, %v1488_v60  ;;  %v960_v43 = vmul.f32 %v1328_v4, %v944_v0  ;;  %v864_v9 = vpop.f32.mrb[7].mxu1 }
 0x310   : > { %v1186_v8 = vadd.f32 -1.0, %v1490_v3  ;;  %v959_v11 = vmul.f32 %v943_v2, %v864_v9  ;;  %v1492_v12 = vpop.eup %1491 }
 0x311   : > { %v1036_v7 = vsel %vm972_vm9, %v1771_v15, %v1187_v63  ;;  %v1005_v13 = vmul.f32 1.442695, %v960_v43  ;;  %v1494_v14 = vpop.eup %1493  ;;  %v1183_v5 = vadd.f32 -1.0, %v1492_v12  ;;  %v946_v15 = vmul.f32 %v1482_v45, %v930_v6 }
 0x312   : > { %1053 = vst.msk [vmem:[%s1751_s29 + $0x48] sm:$0xff] %vm1043_vm2, %v1036_v7  ;;  %v1035_v1 = vsel %vm971_vm10, %v1773_v21, %v1186_v8  ;;  %v1003_v17 = vmul.f32 1.442695, %v959_v11  ;;  %v1182_v18 = vadd.f32 -1.0, %v1494_v14  ;;  %v945_v21 = vmul.f32 %v1776_v25, %v929_v10 }
 0x313   : > { %1052 = vst.msk [vmem:[%s1751_s29 + $0x40] sm:$0xff] %vm1043_vm2, %v1035_v1  ;;  %1499 = vpow2.f32 %v1005_v13  ;;  %v1032_v20 = vsel %vm968_vm11, %v1780_v30, %v1183_v5  ;;  %vm976_vm15 = vcmp.gt.f32.partialorder %v960_v43, 0.0  ;;  %vm975_vm0 = vcmp.gt.f32.partialorder %v959_v11, 0.0 }
 0x314   : > { %1501 = vpow2.f32 %v1003_v17  ;;  %1049 = vst.msk [vmem:[%s1751_s29 + $0x28] sm:$0xff] %vm1043_vm2, %v1032_v20  ;;  %v1031_v23 = vsel %vm967_vm12, %v1782_v32, %v1182_v18 }
 0x315   : > { %v1331_v19 = vpop.f32.mrb[8].mxu1  ;;  %v1496_v22 = vpop.eup %1495  ;;  %1048 = vst.msk [vmem:[%s1751_s29 + $0x20] sm:$0xff] %vm1043_vm2, %v1031_v23 }
 0x316   : > { %v962_v24 = vmul.f32 %v1331_v19, %v946_v15  ;;  %v874_v26 = vpop.f32.mrb[9].mxu1  ;;  %v1498_v16 = vpop.eup %1497  ;;  %v1189_v28 = vadd.f32 -1.0, %v1496_v22 }
 0x317   : > { %v961_v29 = vmul.f32 %v945_v21, %v874_v26  ;;  %v1188_v30 = vadd.f32 -1.0, %v1498_v16 }
 0x318   : > { %v1009_v31 = vmul.f32 1.442695, %v962_v24  ;;  %v1038_v25 = vsel %vm974_vm13, %v1789_v47, %v1189_v28  ;;  %vm978_vm1 = vcmp.gt.f32.partialorder %v962_v24, 0.0 }
 0x319   : > { %v1007_v33 = vmul.f32 1.442695, %v961_v29  ;;  %1055 = vst.msk [vmem:[%s1751_s29 + $0x58] sm:$0xff] %vm1043_vm2, %v1038_v25  ;;  %v1037_v32 = vsel %vm973_vm14, %v1793_v27, %v1188_v30  ;;  %vm977_vm3 = vcmp.gt.f32.partialorder %v961_v29, 0.0 }
 0x31a   : > { %1503 = vpow2.f32 %v1009_v31  ;;  %1054 = vst.msk [vmem:[%s1751_s29 + $0x50] sm:$0xff] %vm1043_vm2, %v1037_v32 }
 0x31b   : > { %1505 = vpow2.f32 %v1007_v33 }
 0x31d   : > { %v1500_v34 = vpop.eup %1499 }
 0x31e   : > { %v1502_v35 = vpop.eup %1501  ;;  %v1191_v36 = vadd.f32 -1.0, %v1500_v34 }
 0x31f   : > { %v1190_v38 = vadd.f32 -1.0, %v1502_v35 }
 0x320   : > { %v1040_v40 = vsel %vm976_vm15, %v960_v43, %v1191_v36 }
 0x321   : > { %1057 = vst.msk [vmem:[%s1751_s29 + $0x68] sm:$0xff] %vm1043_vm2, %v1040_v40  ;;  %v1039_v41 = vsel %vm975_vm0, %v959_v11, %v1190_v38 }
 0x322   : > { %1056 = vst.msk [vmem:[%s1751_s29 + $0x60] sm:$0xff] %vm1043_vm2, %v1039_v41 }
 0x324   : > { %v1504_v42 = vpop.eup %1503 }
 0x325   : > { %v1506_v37 = vpop.eup %1505  ;;  %v1193_v44 = vadd.f32 -1.0, %v1504_v42 }
 0x326   : > { %v1192_v45 = vadd.f32 -1.0, %v1506_v37 }
 0x327   : > { %v1042_v46 = vsel %vm978_vm1, %v962_v24, %v1193_v44 }
 0x328   : > { %1059 = vst.msk [vmem:[%s1751_s29 + $0x78] sm:$0xff] %vm1043_vm2, %v1042_v46  ;;  %v1041_v47 = vsel %vm977_vm3, %v961_v29, %v1192_v45 }
 0x329   : > { %1058 = vst.msk [vmem:[%s1751_s29 + $0x70] sm:$0xff] %vm1043_vm2, %v1041_v47 }
 0x32a PF: > { %s13_s14 = sadd.s32 1, %s1529_s14   ;;  %s1859_s12 = smov %s1525_s13 }
 0x32b   : > { %p10_p5 = scmp.ge.s32.totalorder %s13_s14, 6   ;;  %s1860_s13 = smov %s1862_s15 }
 0x32d   :  { %12 = sbr.rel (!%p10_p5) target bundleno = 2 (0x2), region = 70 }

</bundles_post_ra>
